<compile_context>
chip_gen: v7x
topology: tpu7x:2x2x1
jax: 0.10.0
libtpu: 0.0.40
codegen_flags: <defaults>
</compile_context>

<pallas_src>
import functools

import jax
import jax.numpy as jnp
from jax.experimental import pallas as pl
from jax.experimental.pallas import tpu as pltpu


def _round_up(x: int, m: int) -> int:
    return ((x + m - 1) // m) * m


def _vmem_budgets():
    """(tile-budget bytes, vmem_limit_bytes) chosen per TPU generation."""
    try:
        vmem = int(pltpu.get_tpu_info().vmem_capacity_bytes)
    except Exception:
        vmem = 64 * 1024 * 1024  # conservative default (v7x per-TC size)
    if vmem >= 100 * 1024 * 1024:
        # v5e / v6e: 128 MiB physical VMEM -> big tiles, fewer grid steps.
        return 64 * 1024 * 1024, 100 * 1024 * 1024
    # v7x: 64 MiB per TensorCore -> keep the conservative sizing.
    return 24 * 1024 * 1024, 32 * 1024 * 1024


def _row_losses(scores, labels):
    """Per-row BCE sums (PyTorch per-term log clamp), divide hoisted to once/row."""
    x = scores.astype(jnp.float32)
    lab = labels.astype(jnp.float32)
    log_x = jnp.maximum(jnp.log(x), -100.0)          # EUP log, per-term clamp
    log_1mx = jnp.maximum(jnp.log(1.0 - x), -100.0)  # EUP log, per-term clamp
    d = log_x - log_1mx                              # fused (s1 - s3) weight
    s13 = jnp.sum(lab * d, axis=1, keepdims=True)    # (rows, 1)
    s2 = jnp.sum(log_1mx, axis=1, keepdims=True)     # (rows, 1)
    lsum = jnp.sum(lab, axis=1, keepdims=True)       # (rows, 1)
    # row_loss = -sum_c [ y*log_x + (1-y)*log_1mx ],  y = label / lsum
    return -(s13 / lsum + s2)                        # (rows, 1)


def _single_block_kernel(scores_ref, label_ref, o_ref, *, inv_n):
    row_loss = _row_losses(scores_ref[...], label_ref[...])
    o_ref[...] = jnp.sum(row_loss, keepdims=True) * inv_n


def _tiled_kernel(scores_ref, label_ref, o_ref, *, tm, tile_offset, row_cut, b_real):
    h = pl.program_id(0)  # TensorCore half ("parallel")
    j = pl.program_id(1)  # row-tile reduction step ("arbitrary")

    @pl.when(j == 0)
    def _():
        o_ref[...] = jnp.zeros_like(o_ref)

    row_loss = _row_losses(scores_ref[...], label_ref[...])  # (tm, 1)

    # Global row index of each row in this block.
    rows = (h * tile_offset + j) * tm + jax.lax.broadcasted_iota(jnp.int32, (tm, 1), 0)
    # Mask (a) garbage rows of the ragged last block (rows >= b_real) and
    # (b) the overlap rows the other half already counted (odd tile counts only).
    valid = (rows < b_real) & (rows >= h * row_cut)
    row_loss = jnp.where(valid, row_loss, 0.0)

    # Accumulate into the resident lane-dense (1,128) per-half block.
    o_ref[...] += jnp.sum(row_loss)


def action_loss(video_scores: jax.Array, label: jax.Array, *,
                tm_cap: int = 1024, force_tiled: bool = False) -> jax.Array:
    """video_scores, label: [B, C] arrays. Returns scalar f32 BCE loss with
    row-normalized labels (identical semantics to the PyTorch module)."""
    B, C = video_scores.shape
    inv_n = 1.0 / float(B * C)
    in_bytes = 2 * B * C * 4

    # ---- Fast path: whole problem in one block (typical ActionLoss shapes). ----
    if not force_tiled and in_bytes <= 8 * 1024 * 1024:
        out = pl.pallas_call(
            functools.partial(_single_block_kernel, inv_n=inv_n),
            out_shape=jax.ShapeDtypeStruct((1, 1), jnp.float32),
            compiler_params=pltpu.CompilerParams(vmem_limit_bytes=32 * 1024 * 1024),
        )(video_scores, label)
        return out[0, 0]

    # ---- Tiled path: 2 "parallel" halves (dual-TC on v7x) x "arbitrary" row tiles. ----
    budget, vmem_limit = _vmem_budgets()
    bytes_per_row = 2 * 2 * C * 4  # two f32 inputs, double-buffered
    tm = min(tm_cap, budget // bytes_per_row, _round_up(B, 8))
    tm = max(8, (tm // 8) * 8)

    num_tiles = pl.cdiv(B, tm)
    tiles_per_half = pl.cdiv(num_tiles, 2)
    tile_offset = num_tiles - tiles_per_half  # half-1 start tile (overlaps one tile if odd)
    row_cut = tiles_per_half * tm             # rows below this belong to half 0

    kernel = functools.partial(
        _tiled_kernel, tm=tm, tile_offset=tile_offset, row_cut=row_cut, b_real=B
    )
    in_map = lambda h, j: (h * tile_offset + j, 0)

    # TODO(synk): if profiling shows exposed DMA for tiny C with capped tm, raise
    # pipeline depth via pipeline_mode=pl.Buffered(3) on the two input BlockSpecs.
    out = pl.pallas_call(
        kernel,
        out_shape=jax.ShapeDtypeStruct((2, 128), jnp.float32),
        grid=(2, tiles_per_half),
        in_specs=[
            pl.BlockSpec((tm, C), in_map),   # unpadded blocks straight from HBM
            pl.BlockSpec((tm, C), in_map),
        ],
        out_specs=pl.BlockSpec((1, 128), lambda h, j: (h, 0)),
        compiler_params=pltpu.CompilerParams(
            dimension_semantics=("parallel", "arbitrary"),
            vmem_limit_bytes=vmem_limit,
        ),
    )(video_scores, label)

    # Per-half partial sums (replicated across lanes); tiny scalar reduce in wrapper.
    return (out[0, 0] + out[1, 0]) * inv_n


def _reference(video_scores, label):
    y = label / jnp.sum(label, axis=1, keepdims=True)
    log_x = jnp.maximum(jnp.log(video_scores), -100.0)
    log_1mx = jnp.maximum(jnp.log(1.0 - video_scores), -100.0)
    return jnp.mean(-(y * log_x + (1.0 - y) * log_1mx))


if __name__ == "__main__":
    key = jax.random.PRNGKey(0)
    k1, k2, k3, k4, k5, k6 = jax.random.split(key, 6)

    # ---- Case 1: module-sized small shape -> single-block fast path ----
    B, C = 2, 16
    scores = jax.random.uniform(k1, (B, C), dtype=jnp.float32, minval=1e-3, maxval=1.0 - 1e-3)
    lab = jax.random.bernoulli(k2, p=0.3, shape=(B, C)).astype(jnp.float32)
    lab = lab.at[:, 0].set(1.0)  # guarantee a positive per row (avoid 0/0 like PyTorch would NaN)
    loss = jax.block_until_ready(action_loss(scores, lab))
    ref = _reference(scores, lab)
    assert jnp.allclose(loss, ref, rtol=1e-5, atol=1e-5), (loss, ref)

    # ---- Case 2: forced tiled path, odd tile count (ragged last block + half overlap mask) ----
    B2, C2 = 20, 130
    scores2 = jax.random.uniform(k3, (B2, C2), dtype=jnp.float32, minval=1e-3, maxval=1.0 - 1e-3)
    lab2 = jax.random.bernoulli(k4, p=0.2, shape=(B2, C2)).astype(jnp.float32)
    lab2 = lab2.at[:, 0].set(1.0)
    loss2 = jax.block_until_ready(action_loss(scores2, lab2, tm_cap=8, force_tiled=True))
    ref2 = _reference(scores2, lab2)
    assert jnp.allclose(loss2, ref2, rtol=1e-5, atol=1e-5), (loss2, ref2)

    # ---- Case 3: forced tiled path, even tile count ----
    B3, C3 = 32, 128
    scores3 = jax.random.uniform(k5, (B3, C3), dtype=jnp.float32, minval=1e-3, maxval=1.0 - 1e-3)
    lab3 = jax.random.bernoulli(k6, p=0.25, shape=(B3, C3)).astype(jnp.float32)
    lab3 = lab3.at[:, 0].set(1.0)
    loss3 = jax.block_until_ready(action_loss(scores3, lab3, tm_cap=8, force_tiled=True))
    ref3 = _reference(scores3, lab3)
    assert jnp.allclose(loss3, ref3, rtol=1e-5, atol=1e-5), (loss3, ref3)

    print("KERNEL_OK")
</pallas_src>

<mosaic_0001>
module attributes {stable_mosaic.version = 11 : i64} {
  func.func @_single_block_kernel(%arg0: memref<2x16xf32, #tpu.memory_space<vmem>>, %arg1: memref<2x16xf32, #tpu.memory_space<vmem>>, %arg2: memref<1x1xf32, #tpu.memory_space<vmem>>) attributes {dimension_semantics = [], scalar_prefetch = 0 : i64, scratch_operands = 0 : i64, tpu.core_type = #tpu.core_type<tc>} {
    %c0 = arith.constant 0 : index
    %c0_0 = arith.constant 0 : index
    %0 = vector.load %arg0[%c0, %c0_0] : memref<2x16xf32, #tpu.memory_space<vmem>>, vector<2x16xf32>
    %c0_1 = arith.constant 0 : index
    %c0_2 = arith.constant 0 : index
    %1 = vector.load %arg1[%c0_1, %c0_2] : memref<2x16xf32, #tpu.memory_space<vmem>>, vector<2x16xf32>
    %2 = math.log %0 : vector<2x16xf32>
    %cst = arith.constant -1.000000e+02 : f32
    %3 = vector.broadcast %cst : f32 to vector<2x16xf32>
    %4 = arith.maximumf %2, %3 : vector<2x16xf32>
    %cst_3 = arith.constant 1.000000e+00 : f32
    %5 = vector.broadcast %cst_3 : f32 to vector<2x16xf32>
    %6 = arith.subf %5, %0 : vector<2x16xf32>
    %7 = math.log %6 : vector<2x16xf32>
    %cst_4 = arith.constant -1.000000e+02 : f32
    %8 = vector.broadcast %cst_4 : f32 to vector<2x16xf32>
    %9 = arith.maximumf %7, %8 : vector<2x16xf32>
    %10 = arith.subf %4, %9 : vector<2x16xf32>
    %11 = arith.mulf %1, %10 : vector<2x16xf32>
    %cst_5 = arith.constant dense<0.000000e+00> : vector<2xf32>
    %12 = vector.multi_reduction <add>, %11, %cst_5 [1] : vector<2x16xf32> to vector<2xf32>
    %13 = vector.shape_cast %12 : vector<2xf32> to vector<2x1xf32>
    %cst_6 = arith.constant dense<0.000000e+00> : vector<2xf32>
    %14 = vector.multi_reduction <add>, %9, %cst_6 [1] : vector<2x16xf32> to vector<2xf32>
    %15 = vector.shape_cast %14 : vector<2xf32> to vector<2x1xf32>
    %cst_7 = arith.constant dense<0.000000e+00> : vector<2xf32>
    %16 = vector.multi_reduction <add>, %1, %cst_7 [1] : vector<2x16xf32> to vector<2xf32>
    %17 = vector.shape_cast %16 : vector<2xf32> to vector<2x1xf32>
    %18 = arith.divf %13, %17 : vector<2x1xf32>
    %19 = arith.addf %18, %15 : vector<2x1xf32>
    %cst_8 = arith.constant 0.000000e+00 : f32
    %20 = vector.broadcast %cst_8 : f32 to vector<2x1xf32>
    %21 = arith.subf %20, %19 : vector<2x1xf32>
    %22 = vector.shape_cast %21 : vector<2x1xf32> to vector<1x2x1xf32>
    %cst_9 = arith.constant dense<0.000000e+00> : vector<1xf32>
    %23 = vector.multi_reduction <add>, %22, %cst_9 [1, 2] : vector<1x2x1xf32> to vector<1xf32>
    %24 = vector.shape_cast %23 : vector<1xf32> to vector<1x1x1xf32>
    %25 = vector.extract %24[0, 0, 0] : f32 from vector<1x1x1xf32>
    %26 = vector.broadcast %25 : f32 to vector<1x1xf32>
    %cst_10 = arith.constant 3.125000e-02 : f32
    %27 = vector.broadcast %cst_10 : f32 to vector<1x1xf32>
    %28 = arith.mulf %26, %27 : vector<1x1xf32>
    %c0_11 = arith.constant 0 : index
    %c0_12 = arith.constant 0 : index
    %29 = vector.load %arg2[%c0_11, %c0_12] : memref<1x1xf32, #tpu.memory_space<vmem>>, vector<1x1xf32>
    tpu.vector_store %arg2[%c0_11, %c0_12], %28 {strides = array<i32>} : memref<1x1xf32, #tpu.memory_space<vmem>>, vector<1x1xf32>,
    return
  }
}

</mosaic_0001>

<bundles_post_ra>
// kernel: tpu_custom_call.1
= control target key start
LH: loop header
LB: loop body
LE: loop exit
PB: predicated region body
PF: predicated region fallthrough
CT: control target
= control target key end

     0   :  { %7 = vsyncpa [#allocation3], 0  ;;  %s184_s0 = inlined_call_operand.hbm [shape: f32[2,16], index: 0, kind: input, shape index: {}]   ;;  %s185_s1 = inlined_call_operand.vmem [shape: f32[2,16], index: 1, kind: input, shape index: {}]   ;;  %s186_s2 = inlined_call_operand.hbm [shape: f32[1,1], index: 2, kind: output, shape index: {}]  }
   0x1   :  { %8 = vsyncpa [#allocation4], 0  ;;  %s137_s9 = smov [#allocation2]   ;;  %s89_s13 = scalar_lea.hbm %s184_s0, 32 }
   0x2   :  { %s15_s10 = sshll.u32 %s137_s9, 4  ;;  %p90_p0 = scmp.ne.s32.totalorder %s184_s0, %s89_s13  ;;  %s16_s10 = int_to_ptr.vmem [resolvable:$true] %s15_s10 }
   0x3   :  { %p93_p1 = scmp.lt.u32.totalorder %s89_s13, %s184_s0 }
   0x5   :  { %p95_p2 = pnand %p93_p1, %p90_p0 }
   0x7   :  { %98 = shalt.err (!%p95_p2)
}
   0x8   :  { %s99_s18 = scalar_lea.vmem %s16_s10, 32  ;;  %p104_p4 = scmp.lt.s32.totalorder %s16_s10, %s16_s10 }
   0x9   :  { %p100_p3 = scmp.ne.s32.totalorder %s16_s10, %s99_s18  ;;  %p105_p5 = scmp.lt.s32.totalorder %s99_s18, %s99_s18 }
   0xb   :  { %p106_p6 = por %p105_p5, %p104_p4 }
   0xd   :  { %p107_p7 = pnand %p106_p6, %p100_p3 }
   0xf   :  { %110 = shalt.err (!%p107_p7)
}
  0x10   :  { %18 = dma.hbm_to_vmem [thread:$0]  %s184_s0, 32, %s16_s10, [#allocation3]  }
  0x11   :  { %133 = dma.done.wait [#allocation3], 32  }
  0x12   :  { %134 = vsyncadd [#allocation3], 4294967264  ;;  %vm35_vm0 = vcmask 123904   ;;  %v25_v0 = vld [vmem:[%s185_s1] sm:$0x3]  ;;  %vm49_vm1 = vcmask 1024  }
  0x13   :  { %v24_v1 = vld [vmem:[#allocation2] sm:$0x3]  ;;  %v42_v2 = vsel %vm35_vm0, %v25_v0, 0.0  ;;  %s138_s0 = smov [#allocation5]   ;;  %vm62_vm2 = vcmask 0  }
  0x14   :  { %83 = vlog2.f32 %v24_v1  ;;  %v29_v3 = vsub.f32 1.0, %v24_v1  ;;  %43 = vadd.xlane.f32.xlu0 %v42_v2  ;;  %s70_s1 = sshll.u32 %s138_s0, 4  ;;  %s71_s1 = int_to_ptr.vmem [resolvable:$true] %s70_s1 }
  0x15   :  { %s111_s24 = scalar_lea.vmem %s71_s1, 16  ;;  %s115_s25 = scalar_lea.vmem %s71_s1, 32 }
  0x16   :  { %85 = vlog2.f32 %v29_v3  ;;  %p112_p8 = scmp.ne.s32.totalorder %s71_s1, %s111_s24  ;;  %p116_p9 = scmp.lt.s32.totalorder %s71_s1, %s71_s1 }
  0x17   :  { %p117_p10 = scmp.lt.s32.totalorder %s115_s25, %s111_s24 }
  0x19   :  { %p118_p11 = por %p117_p10, %p116_p9 }
  0x1b   :  { %p119_p12 = pnand %p118_p11, %p112_p8 }
  0x1e   :  { %v84_v4 = vpop.eup %83 }
  0x1f   :  { %v27_v5 = vmul.f32 0.6931472, %v84_v4 }
  0x20   :  { %v86_v6 = vpop.eup %85 }
  0x21   :  { %v28_v7 = vmax.f32 %v27_v5, -100.0  ;;  %v31_v8 = vmul.f32 0.6931472, %v86_v6 }
  0x23   :  { %v32_v9 = vmax.f32 %v31_v8, -100.0 }
  0x25   :  { %v33_v10 = vsub.f32 %v28_v7, %v32_v9  ;;  %v39_v11 = vsel %vm35_vm0, %v32_v9, 0.0 }
  0x26   :  { %40 = vadd.xlane.f32.xlu1 %v39_v11 }
  0x27   :  { %v34_v12 = vmul.f32 %v33_v10, %v25_v0 }
  0x29   :  { %v36_v13 = vsel %vm35_vm0, %v34_v12, 0.0 }
  0x2a   :  { %37 = vadd.xlane.f32.xlu0 %v36_v13 }
  0xa1   :  { %v44_v14 = vpop.xlane.xlu0 %43 }
  0xa2   :  { %87 = vrcp.f32 %v44_v14 }
  0xac   :  { %v88_v15 = vpop.eup %87 }
  0xb3   :  { %v41_v17 = vpop.xlane.xlu1 %40 }
  0xb7   :  { %v38_v16 = vpop.xlane.xlu0 %37 }
  0xb8   :  { %v46_v18 = vmul.f32 %v88_v15, %v38_v16 }
  0xba   :  { %v47_v19 = vadd.f32 %v46_v18, %v41_v17 }
  0xbc   :  { %v48_v20 = vsub.f32 0.0, %v47_v19 }
  0xbe   :  { %v50_v21 = vsel %vm49_vm1, %v48_v20, 0.0 }
  0xbf   :  { %51 = vadd.xlane.f32.xlu1 %v50_v21 }
 0x14c   :  { %v52_v22 = vpop.xlane.xlu1 %51 }
 0x14d   :  { %v53_v23 = vrot.slane %v52_v22, 4 }
 0x14f   :  { %v54_v24 = vadd.f32 %v53_v23, %v52_v22 }
 0x151   :  { %v55_v25 = vrot.slane %v54_v24, 2 }
 0x153   :  { %v56_v26 = vadd.f32 %v55_v25, %v54_v24 }
 0x155   :  { %v57_v27 = vrot.slane %v56_v26, 1 }
 0x157   :  { %v58_v28 = vadd.f32 %v57_v27, %v56_v26 }
 0x159   :  { %79 = vpush %v58_v28 }
 0x18a   :  { %s80_s23 = spop %79 }
 0x18b   :  { %v60_v29 = vstv %s80_s23 }
 0x18c   :  { %v61_v30 = vmul.f32 0.03125, %v60_v29 }
 0x18e   :  { %63 = vst.msk [vmem:[#allocation5] sm:$0x1] %vm62_vm2, %v61_v30 }
 0x18f   :  { %122 = shalt.err (!%p119_p12)
}
 0x190   :  { %s123_s28 = scalar_lea.hbm %s186_s2, 16 }
 0x191   :  { %p124_p13 = scmp.ne.s32.totalorder %s186_s2, %s123_s28  ;;  %p127_p0 = scmp.lt.u32.totalorder %s123_s28, %s186_s2 }
 0x193   :  { %p129_p1 = pnand %p127_p0, %p124_p13 }
 0x195   :  { %132 = shalt.err (!%p129_p1)
}
 0x196   :  { %73 = dma.vmem_to_hbm [thread:$0]  %s71_s1, 16, %s186_s2, [#allocation4]  }
 0x197   :  { %135 = dma.done.wait [#allocation4], 16  }
 0x198   :  { %136 = vsyncadd [#allocation4], 4294967280 }
 0x199   :  { %77 = vsyncpa [#allocation3], 1 }
 0x19a   :  { %78 = vsyncpa [#allocation4], 1 }

</bundles_post_ra>
